<compile_context>
chip_gen: v6e
topology: v6e:2x2x1
jax: 0.10.0
libtpu: 0.0.40
codegen_flags: <defaults>
</compile_context>

<pallas_src>
import math

import jax
import jax.numpy as jnp
import numpy as np
from jax.experimental import pallas as pl
from jax.experimental.pallas import tpu as pltpu


def rnn_model_kernel(tok_ref, h0_ref, wih_ref, whh_ref, bh_ref,
                     wout_ref, bout_ref,
                     out_ref, hN_ref):
    """Hoisted input projection -> unrolled tanh recurrence (register-resident Y) -> lane-dense linear."""
    TB, _ = out_ref.shape          # (T*B, V_pad)
    B, H = h0_ref.shape            # (batch, hidden)
    V = wih_ref.shape[0]           # vocab
    T = TB // B

    # ---- Input projection for all timesteps at once (off the serial critical path). ----
    # XW = one_hot(tokens) @ W_ih.T + (b_ih + b_hh), shape (T*B, H).
    tok = tok_ref[...]                                               # (T*B, 1) int32
    iota_v = jax.lax.broadcasted_iota(jnp.int32, (TB, V), 1)
    x_onehot = (tok == iota_v).astype(jnp.float32)                   # (T*B, V), transient value
    xw = (jnp.dot(x_onehot, wih_ref[...],
                  preferred_element_type=jnp.float32)
          + bh_ref[...])                                             # (T*B, H)

    whh = whh_ref[...]                                               # (H, H) == W_hh.T
    h = h0_ref[...]                                                  # (B, H)

    # ---- Serial recurrence: only h @ W_hh.T + tanh per step; statically unrolled (T small). ----
    ys = []
    for t in range(T):
        h = jnp.tanh(xw[t * B:(t + 1) * B, :]
                     + jnp.dot(h, whh, preferred_element_type=jnp.float32))
        ys.append(h)                                                 # stays in registers

    hN_ref[...] = h                                                  # final hidden state (B, H)

    # ---- Output linear over the register-resident (T*B, H) slab; 128-lane-padded store. ----
    y = jnp.concatenate(ys, axis=0)                                  # (T*B, H), no VMEM round-trip
    out_ref[...] = (jnp.dot(y, wout_ref[...],
                            preferred_element_type=jnp.float32)
                    + bout_ref[...])


def rnn_model_forward(tokens, state, params):
    """tokens: (B, T) int32, state: (1, B, H) f32. Returns (logits (T*B, V), state (1, B, H))."""
    wih_t, whh_t, b_h, wout_t, b_out = params
    B, T = tokens.shape
    V, H = wih_t.shape

    # Time-major + flattened in the wrapper so the kernel never reshapes across tile boundaries.
    tok_flat = tokens.T.reshape(T * B, 1).astype(jnp.int32)
    h0 = state[0].astype(jnp.float32)                                # (B, H)

    # Lane-dense output: pad the vocab dim of the output projection up to a 128 multiple
    # (pure layout plumbing; MXU computes 128-wide tiles regardless, store becomes unmasked).
    V_pad = max(128, ((V + 127) // 128) * 128)
    wout_pad = jnp.zeros((H, V_pad), jnp.float32).at[:, :V].set(wout_t)
    bout_pad = jnp.zeros((1, V_pad), jnp.float32).at[:, :V].set(b_out)

    vmem = pl.BlockSpec(memory_space=pltpu.MemorySpace.VMEM)
    out_pad, h_n = pl.pallas_call(
        rnn_model_kernel,
        out_shape=(jax.ShapeDtypeStruct((T * B, V_pad), jnp.float32),
                   jax.ShapeDtypeStruct((B, H), jnp.float32)),
        in_specs=[vmem] * 7,
        out_specs=(vmem, vmem),
        compiler_params=pltpu.CompilerParams(
            vmem_limit_bytes=32 * 1024 * 1024),                      # headroom-safe on v7x too
    )(tok_flat, h0, wih_t, whh_t, b_h, wout_pad, bout_pad)

    return out_pad[:, :V], h_n[None]                                 # slice padding; state -> (1, B, H)


def reference_forward(tokens, state, raw_params, V, H):
    W_ih, W_hh, b_ih, b_hh, W_lin, b_lin = raw_params
    X = jax.nn.one_hot(tokens.T, V, dtype=jnp.float32)               # (T, B, V)
    hi = jax.lax.Precision.HIGHEST

    def step(h, x):
        h = jnp.tanh(jnp.dot(x, W_ih.T, precision=hi) + b_ih
                     + jnp.dot(h, W_hh.T, precision=hi) + b_hh)
        return h, h

    h_T, Y = jax.lax.scan(step, state[0], X)
    out = jnp.dot(Y.reshape(-1, H), W_lin.T, precision=hi) + b_lin
    return out, h_T[None]


if __name__ == "__main__":
    V = 32      # vocab_size
    H = 32      # num_hiddens
    B = 2       # batch
    T = 8       # sequence length (num_steps)

    key = jax.random.PRNGKey(0)
    kt, k1, k2, k3, k4, k5, k6 = jax.random.split(key, 7)
    s = 1.0 / math.sqrt(H)

    # PyTorch parameter shapes: nn.RNN -> W_ih (H, V), W_hh (H, H), b_ih (H,), b_hh (H,)
    #                           nn.Linear(H, V) -> W (V, H), b (V,)
    W_ih = jax.random.uniform(k1, (H, V), jnp.float32, -s, s)
    W_hh = jax.random.uniform(k2, (H, H), jnp.float32, -s, s)
    b_ih = jax.random.uniform(k3, (H,), jnp.float32, -s, s)
    b_hh = jax.random.uniform(k4, (H,), jnp.float32, -s, s)
    W_lin = jax.random.uniform(k5, (V, H), jnp.float32, -s, s)
    b_lin = jax.random.uniform(k6, (V,), jnp.float32, -s, s)

    # Kernel-friendly (pre-transposed / fused-bias) parameter set.
    params = (W_ih.T,                          # (V, H)
              W_hh.T,                          # (H, H)
              (b_ih + b_hh).reshape(1, H),     # (1, H)
              W_lin.T,                         # (H, V)
              b_lin.reshape(1, V))             # (1, V)

    tokens = jax.random.randint(kt, (B, T), 0, V, dtype=jnp.int32)   # inputs
    state = jnp.zeros((1, B, H), jnp.float32)                        # begin_state()

    out, h_n = rnn_model_forward(tokens, state, params)
    out, h_n = jax.block_until_ready((out, h_n))

    ref_out, ref_h = reference_forward(tokens, state,
                                       (W_ih, W_hh, b_ih, b_hh, W_lin, b_lin), V, H)
    assert out.shape == (T * B, V) and h_n.shape == (1, B, H)
    np.testing.assert_allclose(np.asarray(out), np.asarray(ref_out), atol=1e-3, rtol=1e-3)
    np.testing.assert_allclose(np.asarray(h_n), np.asarray(ref_h), atol=1e-3, rtol=1e-3)

    print("KERNEL_OK")
</pallas_src>

<mosaic_0001>
module attributes {stable_mosaic.version = 11 : i64} {
  func.func @rnn_model_kernel(%arg0: memref<16x1xi32, #tpu.memory_space<vmem>>, %arg1: memref<2x32xf32, #tpu.memory_space<vmem>>, %arg2: memref<32x32xf32, #tpu.memory_space<vmem>>, %arg3: memref<32x32xf32, #tpu.memory_space<vmem>>, %arg4: memref<1x32xf32, #tpu.memory_space<vmem>>, %arg5: memref<32x128xf32, #tpu.memory_space<vmem>>, %arg6: memref<1x128xf32, #tpu.memory_space<vmem>>, %arg7: memref<16x128xf32, #tpu.memory_space<vmem>>, %arg8: memref<2x32xf32, #tpu.memory_space<vmem>>) attributes {dimension_semantics = [], scalar_prefetch = 0 : i64, scratch_operands = 0 : i64, tpu.core_type = #tpu.core_type<tc>} {
    %c0 = arith.constant 0 : index
    %c0_0 = arith.constant 0 : index
    %0 = vector.load %arg0[%c0, %c0_0] : memref<16x1xi32, #tpu.memory_space<vmem>>, vector<16x1xi32>
    %1 = tpu.iota {dimensions = array<i32: 1>} : vector<16x32xi32>
    %2 = vector.broadcast %0 : vector<16x1xi32> to vector<16x32xi32>
    %3 = arith.cmpi eq, %2, %1 : vector<16x32xi32>
    %4 = arith.extui %3 : vector<16x32xi1> to vector<16x32xi32>
    %5 = arith.sitofp %4 : vector<16x32xi32> to vector<16x32xf32>
    %c0_1 = arith.constant 0 : index
    %c0_2 = arith.constant 0 : index
    %6 = vector.load %arg2[%c0_1, %c0_2] : memref<32x32xf32, #tpu.memory_space<vmem>>, vector<32x32xf32>
    %cst = arith.constant dense<0.000000e+00> : vector<16x32xf32>
    %7 = tpu.matmul %5, %6, %cst {dimension_numbers = #tpu.dot_dimension_numbers<[1], [0], [0], [1], [0, 0, 1, 1], [], []>} : vector<16x32xf32>, vector<32x32xf32>, vector<16x32xf32> -> vector<16x32xf32>
    %c0_3 = arith.constant 0 : index
    %c0_4 = arith.constant 0 : index
    %8 = vector.load %arg4[%c0_3, %c0_4] : memref<1x32xf32, #tpu.memory_space<vmem>>, vector<1x32xf32>
    %9 = vector.broadcast %8 : vector<1x32xf32> to vector<16x32xf32>
    %10 = arith.addf %7, %9 : vector<16x32xf32>
    %c0_5 = arith.constant 0 : index
    %c0_6 = arith.constant 0 : index
    %11 = vector.load %arg3[%c0_5, %c0_6] : memref<32x32xf32, #tpu.memory_space<vmem>>, vector<32x32xf32>
    %c0_7 = arith.constant 0 : index
    %c0_8 = arith.constant 0 : index
    %12 = vector.load %arg1[%c0_7, %c0_8] : memref<2x32xf32, #tpu.memory_space<vmem>>, vector<2x32xf32>
    %13 = vector.extract_strided_slice %10 {offsets = [0, 0], sizes = [2, 32], strides = [1, 1]} : vector<16x32xf32> to vector<2x32xf32>
    %cst_9 = arith.constant dense<0.000000e+00> : vector<2x32xf32>
    %14 = tpu.matmul %12, %11, %cst_9 {dimension_numbers = #tpu.dot_dimension_numbers<[1], [0], [0], [1], [0, 0, 1, 1], [], []>} : vector<2x32xf32>, vector<32x32xf32>, vector<2x32xf32> -> vector<2x32xf32>
    %15 = arith.addf %13, %14 : vector<2x32xf32>
    %16 = math.tanh %15 : vector<2x32xf32>
    %17 = vector.extract_strided_slice %10 {offsets = [2, 0], sizes = [2, 32], strides = [1, 1]} : vector<16x32xf32> to vector<2x32xf32>
    %cst_10 = arith.constant dense<0.000000e+00> : vector<2x32xf32>
    %18 = tpu.matmul %16, %11, %cst_10 {dimension_numbers = #tpu.dot_dimension_numbers<[1], [0], [0], [1], [0, 0, 1, 1], [], []>} : vector<2x32xf32>, vector<32x32xf32>, vector<2x32xf32> -> vector<2x32xf32>
    %19 = arith.addf %17, %18 : vector<2x32xf32>
    %20 = math.tanh %19 : vector<2x32xf32>
    %21 = vector.extract_strided_slice %10 {offsets = [4, 0], sizes = [2, 32], strides = [1, 1]} : vector<16x32xf32> to vector<2x32xf32>
    %cst_11 = arith.constant dense<0.000000e+00> : vector<2x32xf32>
    %22 = tpu.matmul %20, %11, %cst_11 {dimension_numbers = #tpu.dot_dimension_numbers<[1], [0], [0], [1], [0, 0, 1, 1], [], []>} : vector<2x32xf32>, vector<32x32xf32>, vector<2x32xf32> -> vector<2x32xf32>
    %23 = arith.addf %21, %22 : vector<2x32xf32>
    %24 = math.tanh %23 : vector<2x32xf32>
    %25 = vector.extract_strided_slice %10 {offsets = [6, 0], sizes = [2, 32], strides = [1, 1]} : vector<16x32xf32> to vector<2x32xf32>
    %cst_12 = arith.constant dense<0.000000e+00> : vector<2x32xf32>
    %26 = tpu.matmul %24, %11, %cst_12 {dimension_numbers = #tpu.dot_dimension_numbers<[1], [0], [0], [1], [0, 0, 1, 1], [], []>} : vector<2x32xf32>, vector<32x32xf32>, vector<2x32xf32> -> vector<2x32xf32>
    %27 = arith.addf %25, %26 : vector<2x32xf32>
    %28 = math.tanh %27 : vector<2x32xf32>
    %29 = vector.extract_strided_slice %10 {offsets = [8, 0], sizes = [2, 32], strides = [1, 1]} : vector<16x32xf32> to vector<2x32xf32>
    %cst_13 = arith.constant dense<0.000000e+00> : vector<2x32xf32>
    %30 = tpu.matmul %28, %11, %cst_13 {dimension_numbers = #tpu.dot_dimension_numbers<[1], [0], [0], [1], [0, 0, 1, 1], [], []>} : vector<2x32xf32>, vector<32x32xf32>, vector<2x32xf32> -> vector<2x32xf32>
    %31 = arith.addf %29, %30 : vector<2x32xf32>
    %32 = math.tanh %31 : vector<2x32xf32>
    %33 = vector.extract_strided_slice %10 {offsets = [10, 0], sizes = [2, 32], strides = [1, 1]} : vector<16x32xf32> to vector<2x32xf32>
    %cst_14 = arith.constant dense<0.000000e+00> : vector<2x32xf32>
    %34 = tpu.matmul %32, %11, %cst_14 {dimension_numbers = #tpu.dot_dimension_numbers<[1], [0], [0], [1], [0, 0, 1, 1], [], []>} : vector<2x32xf32>, vector<32x32xf32>, vector<2x32xf32> -> vector<2x32xf32>
    %35 = arith.addf %33, %34 : vector<2x32xf32>
    %36 = math.tanh %35 : vector<2x32xf32>
    %37 = vector.extract_strided_slice %10 {offsets = [12, 0], sizes = [2, 32], strides = [1, 1]} : vector<16x32xf32> to vector<2x32xf32>
    %cst_15 = arith.constant dense<0.000000e+00> : vector<2x32xf32>
    %38 = tpu.matmul %36, %11, %cst_15 {dimension_numbers = #tpu.dot_dimension_numbers<[1], [0], [0], [1], [0, 0, 1, 1], [], []>} : vector<2x32xf32>, vector<32x32xf32>, vector<2x32xf32> -> vector<2x32xf32>
    %39 = arith.addf %37, %38 : vector<2x32xf32>
    %40 = math.tanh %39 : vector<2x32xf32>
    %41 = vector.extract_strided_slice %10 {offsets = [14, 0], sizes = [2, 32], strides = [1, 1]} : vector<16x32xf32> to vector<2x32xf32>
    %cst_16 = arith.constant dense<0.000000e+00> : vector<2x32xf32>
    %42 = tpu.matmul %40, %11, %cst_16 {dimension_numbers = #tpu.dot_dimension_numbers<[1], [0], [0], [1], [0, 0, 1, 1], [], []>} : vector<2x32xf32>, vector<32x32xf32>, vector<2x32xf32> -> vector<2x32xf32>
    %43 = arith.addf %41, %42 : vector<2x32xf32>
    %44 = math.tanh %43 : vector<2x32xf32>
    %c0_17 = arith.constant 0 : index
    %c0_18 = arith.constant 0 : index
    %45 = vector.load %arg8[%c0_17, %c0_18] : memref<2x32xf32, #tpu.memory_space<vmem>>, vector<2x32xf32>
    tpu.vector_store %arg8[%c0_17, %c0_18], %44 {strides = array<i32>} : memref<2x32xf32, #tpu.memory_space<vmem>>, vector<2x32xf32>,
    %46 = tpu.concatenate %16, %20, %24, %28, %32, %36, %40, %44 in 0 : vector<2x32xf32>, vector<2x32xf32>, vector<2x32xf32>, vector<2x32xf32>, vector<2x32xf32>, vector<2x32xf32>, vector<2x32xf32>, vector<2x32xf32> -> vector<16x32xf32>
    %c0_19 = arith.constant 0 : index
    %c0_20 = arith.constant 0 : index
    %47 = vector.load %arg5[%c0_19, %c0_20] : memref<32x128xf32, #tpu.memory_space<vmem>>, vector<32x128xf32>
    %cst_21 = arith.constant dense<0.000000e+00> : vector<16x128xf32>
    %48 = tpu.matmul %46, %47, %cst_21 {dimension_numbers = #tpu.dot_dimension_numbers<[1], [0], [0], [1], [0, 0, 1, 1], [], []>} : vector<16x32xf32>, vector<32x128xf32>, vector<16x128xf32> -> vector<16x128xf32>
    %c0_22 = arith.constant 0 : index
    %c0_23 = arith.constant 0 : index
    %49 = vector.load %arg6[%c0_22, %c0_23] : memref<1x128xf32, #tpu.memory_space<vmem>>, vector<1x128xf32>
    %50 = vector.broadcast %49 : vector<1x128xf32> to vector<16x128xf32>
    %51 = arith.addf %48, %50 : vector<16x128xf32>
    %c0_24 = arith.constant 0 : index
    %c0_25 = arith.constant 0 : index
    %52 = vector.load %arg7[%c0_24, %c0_25] : memref<16x128xf32, #tpu.memory_space<vmem>>, vector<16x128xf32>
    tpu.vector_store %arg7[%c0_24, %c0_25], %51 {strides = array<i32>} : memref<16x128xf32, #tpu.memory_space<vmem>>, vector<16x128xf32>,
    return
  }
}

</mosaic_0001>

<bundles_post_ra>
// kernel: tpu_custom_call.1
= control target key start
LH: loop header
LB: loop body
LE: loop exit
PB: predicated region body
PF: predicated region fallthrough
CT: control target
= control target key end

     0   :  { %14 = vsyncpa [#allocation3], 0  ;;  %s1469_s0 = inlined_call_operand.vmem [shape: s32[16,1], index: 0, kind: input, shape index: {}]   ;;  %s1470_s1 = inlined_call_operand.vmem [shape: f32[2,32], index: 1, kind: input, shape index: {}]   ;;  %s1471_s2 = inlined_call_operand.hbm [shape: f32[32,32], index: 2, kind: input, shape index: {}]   ;;  %s1472_s3 = inlined_call_operand.hbm [shape: f32[32,32], index: 3, kind: input, shape index: {}]   ;;  %s1473_s4 = inlined_call_operand.vmem [shape: f32[1,32], index: 4, kind: input, shape index: {}]   ;;  %s1474_s5 = inlined_call_operand.hbm [shape: f32[32,128], index: 5, kind: input, shape index: {}]   ;;  %s1475_s6 = inlined_call_operand.vmem [shape: f32[1,128], index: 6, kind: input, shape index: {}]   ;;  %s1476_s7 = inlined_call_operand.hbm [shape: f32[16,128], index: 7, kind: output, shape index: {0}]   ;;  %s1477_s8 = inlined_call_operand.hbm [shape: f32[2,32], index: 8, kind: output, shape index: {1}]  }
   0x1   :  { %15 = vsyncpa [#allocation6], 0 }
   0x2   :  { %16 = vsyncpa [#allocation4], 0 }
   0x3   :  { %17 = vsyncpa [#allocation10], 0  ;;  %s1258_s27 = smov [#allocation5]   ;;  %s1259_s29 = smov [#allocation2]  }
   0x4   :  { %s39_s28 = sshll.u32 %s1258_s27, 4  ;;  %s27_s30 = sshll.u32 %s1259_s29, 4  ;;  %s40_s28 = int_to_ptr.vmem [resolvable:$true] %s39_s28  ;;  %s28_s30 = int_to_ptr.vmem [resolvable:$true] %s27_s30 }
   0x5   :  { %s1158_s9 = scalar_lea.vmem %s40_s28, 512  ;;  %p1163_p1 = scmp.lt.s32.totalorder %s40_s28, %s40_s28 }
   0x6   :  { %p1159_p0 = scmp.ne.s32.totalorder %s40_s28, %s1158_s9  ;;  %p1164_p2 = scmp.lt.s32.totalorder %s1158_s9, %s1158_s9 }
   0x8   :  { %p1165_p3 = por %p1164_p2, %p1163_p1 }
   0xa   :  { %p1166_p4 = pnand %p1165_p3, %p1159_p0 }
   0xc   :  { %1169 = shalt.err (!%p1166_p4)
}
   0xd   :  { %s1260_s10 = smov 128   ;;  %s1261_s11 = smov 8  }
   0xe   :  { %45 = dma.hbm_to_vmem [thread:$0]  %s1472_s3, 512, %s40_s28, [#allocation6], %s1260_s10, %s1260_s10, %s1261_s11  }
   0xf   :  { %s1178_s14 = scalar_lea.vmem %s28_s30, 512  ;;  %p1183_p6 = scmp.lt.s32.totalorder %s28_s30, %s28_s30 }
  0x10   :  { %p1179_p5 = scmp.ne.s32.totalorder %s28_s30, %s1178_s14  ;;  %p1184_p7 = scmp.lt.s32.totalorder %s1178_s14, %s1178_s14 }
  0x12   :  { %p1185_p8 = por %p1184_p7, %p1183_p6 }
  0x14   :  { %p1186_p9 = pnand %p1185_p8, %p1179_p5 }
  0x16   :  { %1189 = shalt.err (!%p1186_p9)
}
  0x17   :  { %33 = dma.hbm_to_vmem [thread:$0]  %s1471_s2, 512, %s28_s30, [#allocation3], %s1260_s10, %s1260_s10, %s1261_s11  }
  0x18   :  { %s1262_s17 = smov [#allocation7]  }
  0x19   :  { %s53_s18 = sshll.u32 %s1262_s17, 4  ;;  %s54_s18 = int_to_ptr.vmem [resolvable:$true] %s53_s18 }
  0x1a   :  { %s1198_s19 = scalar_lea.vmem %s54_s18, 512  ;;  %p1203_p11 = scmp.lt.s32.totalorder %s54_s18, %s54_s18 }
  0x1b   :  { %p1199_p10 = scmp.ne.s32.totalorder %s54_s18, %s1198_s19  ;;  %p1204_p12 = scmp.lt.s32.totalorder %s1198_s19, %s1198_s19 }
  0x1d   :  { %p1205_p13 = por %p1204_p12, %p1203_p11 }
  0x1f   :  { %p1206_p0 = pnand %p1205_p13, %p1199_p10 }
  0x21   :  { %1209 = shalt.err (!%p1206_p0)
}
  0x22   :  { %59 = dma.hbm_to_vmem [thread:$0]  %s1474_s5, 512, %s54_s18, [#allocation6], %s1260_s10, %s1260_s10, %s1261_s11  }
  0x23   :  { %1250 = dma.done.wait [#allocation3], 512  }
  0x24   :  { %1251 = vsyncadd [#allocation3], 4294966784 }
  0x25   :  { %1252 = dma.done.wait [#allocation6], 1024  }
  0x26   :  { %1253 = vsyncadd [#allocation6], 4294966272  ;;  %v1263_v0 = vmov 0   ;;  %v1264_v1 = vmov 0.0   ;;  %v71_v2 = vld [vmem:[%s1469_s0] sm:$0xff]  ;;  %v90_v3 = vld [vmem:[#allocation2 + $0x18] sm:$0xff]  ;;  %v73_v13 = vlaneseq }
  0x27   :  { %1133 = vset.pattern.permute.xlu0 %v1263_v0  ;;  %1024 = vmatprep.subr.mxu1 %v1264_v1  ;;  %v89_v4 = vld [vmem:[#allocation2 + $0x10] sm:$0xff]  ;;  %v1335_v5 = vld [vmem:[#allocation5 + $0x18] sm:$0xff]  ;;  %v72_v6 = vld [vmem:[%s1469_s0 + $0x8] sm:$0xff]  ;;  %vm98_vm0 = vcmask 261120   ;;  %vm1265_vm1 = vmmov 0   ;;  %vm810_vm4 = vcmask 1041408  }
  0x28   :  { %76 = vperm.xlu0 %1133, %v71_v2   ;;  %1013 = vmatprep.subr.mxu0 %v90_v3  ;;  %v88_v7 = vld [vmem:[#allocation2 + $0x8] sm:$0xff]  ;;  %v1341_v8 = vld [vmem:[#allocation5 + $0x10] sm:$0xff]  ;;  %v87_v9 = vld [vmem:[#allocation2] sm:$0xff]  ;;  %v74_v14 = vand.u32 127, %v73_v13  ;;  %vm812_vm5 = vcmask 1043456   ;;  %vm814_vm6 = vcmask 1045504  }
  0x29   :  { %1014 = vmatpush3.msra.mxu0 %v90_v3  ;;  %1025 = vmatpush3.msra.mxu1 %v1335_v5  ;;  %v1345_v10 = vld [vmem:[#allocation5 + $0x8] sm:$0xff]  ;;  %v1348_v11 = vld [vmem:[#allocation5] sm:$0xff]  ;;  %v822_v3 = vld [vmem:[#allocation7 + $0x18] sm:$0xff]  ;;  %vm808_vm7 = vcmask 261126  }
  0x2a   :  { %1015 = vmatprep.subr.mxu0 %v89_v4  ;;  %1026 = vmatprep.subr.mxu1 %v1264_v1  ;;  %v184_v12 = vld [vmem:[%s1470_s1] sm:$0x3] }
  0x2b   :  { %1016 = vmatpush3.msra.mxu0 %v89_v4  ;;  %1027 = vmatpush3.msra.mxu1 %v1341_v8  ;;  %v947_v21 = vld [vmem:[%s1473_s4] ss:$0 sm:$0xff]  ;;  %v821_v4 = vld [vmem:[#allocation7 + $0x10] sm:$0xff]  ;;  %s1266_s4 = smov [#allocation9]  }
  0x2c   :  { %79 = vperm.xlu0 %1133, %v72_v6   ;;  %1017 = vmatprep.subr.mxu0 %v88_v7  ;;  %v819_v6 = vld [vmem:[#allocation7] sm:$0xff]  ;;  %s931_s25 = sshll.u32 %s1266_s4, 4  ;;  %s932_s25 = int_to_ptr.vmem [resolvable:$true] %s931_s25 }
  0x2d   :  { %1018 = vmatpush3.msra.mxu0 %v88_v7  ;;  %1028 = vmatprep.subr.mxu1 %v1264_v1  ;;  %s1210_s26 = scalar_lea.vmem %s932_s25, 32  ;;  %p1215_p2 = scmp.lt.s32.totalorder %s932_s25, %s932_s25 }
  0x2e   :  { %1019 = vmatprep.subr.mxu0 %v87_v9  ;;  %1029 = vmatpush3.msra.mxu1 %v1345_v10  ;;  %p1211_p1 = scmp.ne.s32.totalorder %s932_s25, %s1210_s26  ;;  %p1216_p3 = scmp.lt.s32.totalorder %s1210_s26, %s1210_s26 }
  0x2f   :  { %1020 = vmatpush3.msra.mxu0 %v87_v9  ;;  %1030 = vmatprep.subr.mxu1 %v1264_v1 }
  0x30   :  { %1031 = vmatpush3.msra.mxu1 %v1348_v11  ;;  %1032 = vmatprep.mubr.msk.f32.mxu1 %vm1265_vm1, %v1264_v1  ;;  %p1217_p4 = por %p1216_p3, %p1215_p2 }
  0x31   :  { %1033 = vmatmul.mubr.msk.f32.vlgmr.msra.gmra.mxu1 %vm98_vm0, %v184_v12  ;;  %1035 = vmatprep.subr.mxu0 %v1264_v1 }
  0x32   :  { %1046 = vmatprep.subr.mxu1 %v1264_v1  ;;  %1054 = vmatprep.mubr.msk.f32.mxu1 %vm1265_vm1, %v1264_v1  ;;  %p1218_p5 = pnand %p1217_p4, %p1211_p1 }
  0x33   :  { %1047 = vmatpush3.msra.mxu1 %v1335_v5 }
  0x34   :  { %1048 = vmatprep.subr.mxu1 %v1264_v1 }
  0x35   :  { %1049 = vmatpush3.msra.mxu1 %v1341_v8 }
  0x36   :  { %1050 = vmatprep.subr.mxu1 %v1264_v1 }
  0x37   :  { %1051 = vmatpush3.msra.mxu1 %v1345_v10 }
  0x38   :  { %1052 = vmatprep.subr.mxu1 %v1264_v1 }
  0x39   :  { %1053 = vmatpush3.msra.mxu1 %v1348_v11 }
  0x3a   :  { %1068 = vmatprep.subr.mxu1 %v1264_v1 }
  0xa3   :  { %v77_v15 = vpop.permute.xlu0 %76 }
  0xa4   :  { %vm81_vm2 = vcmp.eq.s32.totalorder %v77_v15, %v74_v14 }
  0xa5   :  { %v945_v16 = vsel %vm81_vm2, 1.0, %v1264_v1 }
  0xa6   :  { %1021 = vmatprep.mubr.msk.f32.mxu0 %vm98_vm0, %v945_v16 }
  0xa7   :  { %v80_v17 = vpop.permute.xlu0 %79 }
  0xa8   :  { %vm82_vm3 = vcmp.eq.s32.totalorder %v80_v17, %v74_v14 }
  0xa9   :  { %v946_v18 = vsel %vm82_vm3, 1.0, %v1264_v1 }
  0xaa   :  { %1022 = vmatmul.mubr.msk.f32.vlgmr.msra.gmra.mxu0 %vm98_vm0, %v946_v18 }
  0xab   :  { %1036 = vmatpush3.msra.mxu0 %v1335_v5  ;;  %1043 = vmatprep.mubr.msk.f32.mxu0 %vm1265_vm1, %v1264_v1 }
  0xac   :  { %1037 = vmatprep.subr.mxu0 %v1264_v1 }
  0xad   :  { %1038 = vmatpush3.msra.mxu0 %v1341_v8 }
  0xae   :  { %1039 = vmatprep.subr.mxu0 %v1264_v1 }
  0xaf   :  { %1040 = vmatpush3.msra.mxu0 %v1345_v10 }
  0xb0   :  { %1041 = vmatprep.subr.mxu0 %v1264_v1 }
  0xb1   :  { %1042 = vmatpush3.msra.mxu0 %v1348_v11 }
  0xb2   :  { %1057 = vmatprep.subr.mxu0 %v1264_v1 }
  0xf1   :  { %v254_v19 = vpop.f32.mrf.mxu1 }
  0xf3   :  { %v1034_v20 = vpop.f32.mrf.mxu1 }
 0x16a   :  { %v1023_v22 = vpop.f32.mrf.mxu0 }
 0x16b   :  { %v1388_v23 = vadd.f32 %v1023_v22, %v947_v21 }
 0x16c   :  { %v171_v24 = vpop.f32.mrf.mxu0 }
 0x16d   :  { %v172_v25 = vadd.f32 %v947_v21, %v171_v24 }
 0x16f   :  { %v258_v26 = vadd.f32 %v254_v19, %v172_v25 }
 0x171   :  { %1134 = vtanh.f32 %v258_v26 }
 0x17e   :  { %v1135_v27 = vpop.eup %1134 }
 0x17f   :  { %1044 = vmatmul.mubr.msk.f32.vlgmr.msra.gmra.mxu0 %vm98_vm0, %v1135_v27 }
 0x180   :  { %1058 = vmatpush3.msra.mxu0 %v1335_v5  ;;  %1065 = vmatprep.mubr.msk.f32.mxu0 %vm1265_vm1, %v1264_v1 }
 0x181   :  { %1059 = vmatprep.subr.mxu0 %v1264_v1 }
 0x182   :  { %1060 = vmatpush3.msra.mxu0 %v1341_v8 }
 0x183   :  { %1061 = vmatprep.subr.mxu0 %v1264_v1 }
 0x184   :  { %1062 = vmatpush3.msra.mxu0 %v1345_v10 }
 0x185   :  { %1063 = vmatprep.subr.mxu0 %v1264_v1 }
 0x186   :  { %1064 = vmatpush3.msra.mxu0 %v1348_v11 }
 0x187   :  { %1079 = vmatprep.subr.mxu0 %v1264_v1 }
 0x23f   :  { %v329_v28 = vpop.f32.mrf.mxu0 }
 0x240   :  { %v334_v29 = vrot.slane %v329_v28, 6 }
 0x241   :  { %v1045_v30 = vpop.f32.mrf.mxu0 }
 0x242   :  { %v336_v31 = vadd.f32 %v334_v29, %v172_v25 }
 0x244   :  { %1136 = vtanh.f32 %v336_v31 }
 0x251   :  { %v1137_v32 = vpop.eup %1136 }
 0x252   :  { %v339_v33 = vrot.slane %v1137_v32, 2  ;;  %v811_v39 = vsel %vm810_vm4, %v1135_v27, %v1137_v32 }
 0x254   :  { %1055 = vmatmul.mubr.msk.f32.vlgmr.msra.gmra.mxu1 %vm98_vm0, %v339_v33 }
 0x255   :  { %1069 = vmatpush3.msra.mxu1 %v1335_v5  ;;  %1076 = vmatprep.mubr.msk.f32.mxu1 %vm1265_vm1, %v1264_v1 }
 0x256   :  { %1070 = vmatprep.subr.mxu1 %v1264_v1 }
 0x257   :  { %1071 = vmatpush3.msra.mxu1 %v1341_v8 }
 0x258   :  { %1072 = vmatprep.subr.mxu1 %v1264_v1 }
 0x259   :  { %1073 = vmatpush3.msra.mxu1 %v1345_v10 }
 0x25a   :  { %1074 = vmatprep.subr.mxu1 %v1264_v1 }
 0x25b   :  { %1075 = vmatpush3.msra.mxu1 %v1348_v11 }
 0x25c   :  { %1090 = vmatprep.subr.mxu1 %v1264_v1 }
 0x314   :  { %v408_v34 = vpop.f32.mrf.mxu1 }
 0x315   :  { %v413_v35 = vrot.slane %v408_v34, 4 }
 0x316   :  { %v1056_v36 = vpop.f32.mrf.mxu1 }
 0x317   :  { %v415_v37 = vadd.f32 %v413_v35, %v172_v25 }
 0x319   :  { %1138 = vtanh.f32 %v415_v37 }
 0x326   :  { %v1139_v38 = vpop.eup %1138 }
 0x327   :  { %v418_v40 = vrot.slane %v1139_v38, 4  ;;  %v813_v41 = vsel %vm812_vm5, %v811_v39, %v1139_v38 }
 0x329   :  { %1066 = vmatmul.mubr.msk.f32.vlgmr.msra.gmra.mxu0 %vm98_vm0, %v418_v40 }
 0x32a   :  { %1080 = vmatpush3.msra.mxu0 %v1335_v5  ;;  %1087 = vmatprep.mubr.msk.f32.mxu0 %vm1265_vm1, %v1264_v1 }
 0x32b   :  { %1081 = vmatprep.subr.mxu0 %v1264_v1 }
 0x32c   :  { %1082 = vmatpush3.msra.mxu0 %v1341_v8 }
 0x32d   :  { %1083 = vmatprep.subr.mxu0 %v1264_v1 }
 0x32e   :  { %1084 = vmatpush3.msra.mxu0 %v1345_v10 }
 0x32f   :  { %1085 = vmatprep.subr.mxu0 %v1264_v1 }
 0x330   :  { %1086 = vmatpush3.msra.mxu0 %v1348_v11 }
 0x331   :  { %1101 = vmatprep.subr.mxu0 %v1264_v1 }
 0x3e9   :  { %v487_v42 = vpop.f32.mrf.mxu0 }
 0x3ea   :  { %v492_v43 = vrot.slane %v487_v42, 2 }
 0x3eb   :  { %v1067_v44 = vpop.f32.mrf.mxu0 }
 0x3ec   :  { %v494_v45 = vadd.f32 %v492_v43, %v172_v25 }
 0x3ee   :  { %1140 = vtanh.f32 %v494_v45 }
 0x3fb   :  { %v1141_v46 = vpop.eup %1140 }
 0x3fc   :  { %v497_v47 = vrot.slane %v1141_v46, 6  ;;  %v815_v48 = vsel %vm814_vm6, %v813_v41, %v1141_v46 }
 0x3fe   :  { %1077 = vmatmul.mubr.msk.f32.vlgmr.msra.gmra.mxu1 %vm98_vm0, %v497_v47 }
 0x3ff   :  { %1091 = vmatpush3.msra.mxu1 %v1335_v5  ;;  %1098 = vmatprep.mubr.msk.f32.mxu1 %vm1265_vm1, %v1264_v1 }
 0x400   :  { %1092 = vmatprep.subr.mxu1 %v1264_v1 }
 0x401   :  { %1093 = vmatpush3.msra.mxu1 %v1341_v8 }
 0x402   :  { %1094 = vmatprep.subr.mxu1 %v1264_v1 }
 0x403   :  { %1095 = vmatpush3.msra.mxu1 %v1345_v10 }
 0x404   :  { %1096 = vmatprep.subr.mxu1 %v1264_v1 }
 0x405   :  { %1097 = vmatpush3.msra.mxu1 %v1348_v11 }
 0x406   :  { %1112 = vmatprep.subr.mxu1 %v822_v3 }
 0x4be   :  { %v566_v49 = vpop.f32.mrf.mxu1 }
 0x4bf   :  { %v570_v50 = vadd.f32 %v566_v49, %v1388_v23 }
 0x4c0   :  { %v1078_v51 = vpop.f32.mrf.mxu1 }
 0x4c1   :  { %1142 = vtanh.f32 %v570_v50 }
 0x4ce   :  { %v1143_v52 = vpop.eup %1142 }
 0x4cf   :  { %1088 = vmatmul.mubr.msk.f32.vlgmr.msra.gmra.mxu0 %vm98_vm0, %v1143_v52 }
 0x4d0   :  { %1102 = vmatpush3.msra.mxu0 %v1335_v5  ;;  %1109 = vmatprep.mubr.msk.f32.mxu0 %vm1265_vm1, %v1264_v1  ;;  %v820_v5 = vld [vmem:[#allocation7 + $0x8] sm:$0xff] }
 0x4d1   :  { %1103 = vmatprep.subr.mxu0 %v1264_v1 }
 0x4d2   :  { %1104 = vmatpush3.msra.mxu0 %v1341_v8 }
 0x4d3   :  { %1105 = vmatprep.subr.mxu0 %v1264_v1 }
 0x4d4   :  { %1106 = vmatpush3.msra.mxu0 %v1345_v10 }
 0x4d5   :  { %1107 = vmatprep.subr.mxu0 %v1264_v1 }
 0x4d6   :  { %1108 = vmatpush3.msra.mxu0 %v1348_v11 }
 0x58f   :  { %v641_v53 = vpop.f32.mrf.mxu0 }
 0x590   :  { %v646_v54 = vrot.slane %v641_v53, 6 }
 0x591   :  { %v1089_v55 = vpop.f32.mrf.mxu0 }
 0x592   :  { %v648_v56 = vadd.f32 %v646_v54, %v1388_v23 }
 0x594   :  { %1144 = vtanh.f32 %v648_v56 }
 0x5a1   :  { %v1145_v57 = vpop.eup %1144 }
 0x5a2   :  { %v651_v58 = vrot.slane %v1145_v57, 2  ;;  %v816_v0 = vsel %vm810_vm4, %v1143_v52, %v1145_v57 }
 0x5a4   :  { %1099 = vmatmul.mubr.msk.f32.vlgmr.msra.gmra.mxu1 %vm98_vm0, %v651_v58 }
 0x5a5   :  { %1120 = vmatprep.mubr.msk.f32.mxu1 %vm98_vm0, %v815_v48  ;;  %1113 = vmatpush3.msra.mxu1 %v822_v3 }
 0x5a6   :  { %1114 = vmatprep.subr.mxu1 %v821_v4 }
 0x5a7   :  { %1115 = vmatpush3.msra.mxu1 %v821_v4 }
 0x5a8   :  { %1116 = vmatprep.subr.mxu1 %v820_v5 }
 0x5a9   :  { %1117 = vmatpush3.msra.mxu1 %v820_v5 }
 0x5aa   :  { %1118 = vmatprep.subr.mxu1 %v819_v6 }
 0x5ab   :  { %1119 = vmatpush3.msra.mxu1 %v819_v6 }
 0x664   :  { %v720_v59 = vpop.f32.mrf.mxu1 }
 0x665   :  { %v725_v60 = vrot.slane %v720_v59, 4 }
 0x666   :  { %v1100_v61 = vpop.f32.mrf.mxu1 }
 0x667   :  { %v727_v62 = vadd.f32 %v725_v60, %v1388_v23 }
 0x669   :  { %1146 = vtanh.f32 %v727_v62 }
 0x676   :  { %v1147_v63 = vpop.eup %1146 }
 0x677   :  { %v730_v1 = vrot.slane %v1147_v63, 4  ;;  %v817_v2 = vsel %vm812_vm5, %v816_v0, %v1147_v63 }
 0x679   :  { %1110 = vmatmul.mubr.msk.f32.vlgmr.msra.gmra.mxu0 %vm98_vm0, %v730_v1 }
 0x739   :  { %v799_v7 = vpop.f32.mrf.mxu0 }
 0x73a   :  { %v804_v8 = vrot.slane %v799_v7, 2 }
 0x73b   :  { %v1111_v9 = vpop.f32.mrf.mxu0 }
 0x73c   :  { %v806_v10 = vadd.f32 %v804_v8, %v1388_v23 }
 0x73e   :  { %1148 = vtanh.f32 %v806_v10 }
 0x74b   :  { %v1149_v11 = vpop.eup %1148 }
 0x74c   :  { %v818_v12 = vsel %vm814_vm6, %v817_v2, %v1149_v11  ;;  %809 = vst.msk [vmem:[#allocation9 - $0x6] sm:$0xc0] %vm808_vm7, %v1149_v11 }
 0x74d   :  { %1121 = vmatmul.mubr.msk.f32.vlgmr.msra.gmra.mxu1 %vm98_vm0, %v818_v12 }
 0x74e   :  { %1221 = shalt.err (!%p1218_p5)
}
 0x74f   :  { %934 = dma.vmem_to_hbm [thread:$0]  %s932_s25, 32, %s1477_s8, [#allocation10]   ;;  %v958_v13 = vld [vmem:[%s1475_s6] ss:$0 sm:$0xff] }
 0x750   :  { %s1267_s9 = smov [#allocation8]  }
 0x751   :  { %s918_s12 = sshll.u32 %s1267_s9, 4  ;;  %s919_s12 = int_to_ptr.vmem [resolvable:$true] %s918_s12 }
 0x752   :  { %s1230_s13 = scalar_lea.vmem %s919_s12, 256  ;;  %p1235_p7 = scmp.lt.s32.totalorder %s919_s12, %s919_s12 }
 0x753   :  { %p1231_p6 = scmp.ne.s32.totalorder %s919_s12, %s1230_s13  ;;  %p1236_p8 = scmp.lt.s32.totalorder %s1230_s13, %s1230_s13 }
 0x755   :  { %p1237_p9 = por %p1236_p8, %p1235_p7 }
 0x757   :  { %p1238_p10 = pnand %p1237_p9, %p1231_p6 }
 0x80d   :  { %v1122_v14 = vpop.f32.mrf.mxu1 }
 0x80e   :  { %v908_v15 = vadd.f32 %v1122_v14, %v958_v13 }
 0x80f   :  { %v902_v16 = vpop.f32.mrf.mxu1 }
 0x810   :  { %912 = vst [vmem:[#allocation8 + $0x8] sm:$0xff] %v908_v15  ;;  %v903_v17 = vadd.f32 %v958_v13, %v902_v16 }
 0x812   :  { %911 = vst [vmem:[#allocation8] sm:$0xff] %v903_v17 }
 0x813   :  { %1241 = shalt.err (!%p1238_p10)
}
 0x814   :  { %924 = dma.vmem_to_hbm [thread:$0]  %s919_s12, 256, %s1476_s7, [#allocation4], %s1260_s10, %s1260_s10, %s1261_s11  }
 0x815   :  { %1254 = dma.done.wait [#allocation4], 256  }
 0x816   :  { %1255 = vsyncadd [#allocation4], 4294967040 }
 0x817   :  { %1256 = dma.done.wait [#allocation10], 32  }
 0x818   :  { %1257 = vsyncadd [#allocation10], 4294967264 }
 0x819   :  { %941 = vsyncpa [#allocation3], 1 }
 0x81a   :  { %942 = vsyncpa [#allocation6], 1 }
 0x81b   :  { %943 = vsyncpa [#allocation4], 1 }
 0x81c   :  { %944 = vsyncpa [#allocation10], 1 }

</bundles_post_ra>
